<compile_context>
chip_gen: v5e
topology: v5e:2x2
jax: 0.10.0
libtpu: 0.0.40
codegen_flags: <defaults>
</compile_context>

<pallas_src>
import functools

import jax
import jax.numpy as jnp
from jax.experimental import pallas as pl
from jax.experimental.pallas import tpu as pltpu


def _round_up(x, m):
    return (x + m - 1) // m * m


def _ce_label_smooth_kernel(inputs_ref, targets_ref, loss_ref, *, epsilon, num_classes):
    # inputs_ref : (TB, K) logits, native dtype, VMEM
    # targets_ref: (TB, 1) int32 labels, VMEM
    # loss_ref   : (TB, 1) f32 per-row losses, VMEM
    x = inputs_ref[...]                                   # (TB, K) native dtype
    t = targets_ref[...]                                  # (TB, 1) int32
    TB, K = x.shape

    # Row max + shift in the input dtype; upcast only the shifted values.
    m = jnp.max(x, axis=1, keepdims=True)                 # (TB, 1)
    z = (x - m).astype(jnp.float32)                       # (TB, K) -- only full-size temp

    # Exactly one exp per element (EUP), reductions in f32.
    lse = jnp.log(jnp.sum(jnp.exp(z), axis=1, keepdims=True))     # (TB, 1)
    sum_z = jnp.sum(z, axis=1, keepdims=True)                     # (TB, 1)

    # z[target] via iota-compare + select + row-reduce (no onehot materialized
    # beyond the select itself).
    class_ids = jax.lax.broadcasted_iota(jnp.int32, (TB, K), 1)   # (TB, K)
    z_t = jnp.sum(jnp.where(class_ids == t, z, 0.0),
                  axis=1, keepdims=True)                          # (TB, 1)

    eps = jnp.float32(epsilon)
    # loss_row = lse - (1-eps)*z_t - (eps/K)*sum_z   (K = true num_classes)
    loss_ref[...] = lse - (1.0 - eps) * z_t - (eps / jnp.float32(num_classes)) * sum_z


def cross_entropy_label_smooth(inputs, targets, *, num_classes, epsilon=0.1,
                               block_batch=256):
    """inputs: (B, num_classes) float logits; targets: (B,) int labels.

    Returns a scalar f32: sum_classes(mean_batch(-smooth * log_softmax(inputs))).
    """
    B, K = inputs.shape
    assert K == num_classes

    # Batch tile: multiple of 8 sublanes, at most `block_batch`, never bigger
    # than (rounded-up) B.  Pad the batch so the grid divides evenly; padded
    # rows are dropped in the final reduction.
    TB = min(block_batch, _round_up(B, 8))
    B_pad = _round_up(B, TB)
    if B_pad != B:
        inputs = jnp.pad(inputs, ((0, B_pad - B), (0, 0)))
        targets = jnp.pad(targets, ((0, B_pad - B),))
    targets_col = targets.astype(jnp.int32).reshape(B_pad, 1)

    grid = (B_pad // TB,)
    kernel = functools.partial(_ce_label_smooth_kernel,
                               epsilon=float(epsilon), num_classes=int(K))

    in_itemsize = inputs.dtype.itemsize
    # double-buffered input/target/output tiles + f32 in-kernel temporaries.
    vmem_est = (2 * TB * K * in_itemsize        # inputs (x2 buffers)
                + 2 * TB * 4                    # targets
                + 2 * TB * 4                    # per-row loss output
                + 3 * TB * K * 4                # z / exp(z) / select temporaries
                + (1 << 20))                    # headroom
    cost = pl.CostEstimate(
        flops=int(6 * B_pad * K),
        transcendentals=int(B_pad * K),
        bytes_accessed=int(B_pad * K * in_itemsize + B_pad * 4 + B_pad * 4),
    )

    per_row = pl.pallas_call(
        kernel,
        out_shape=jax.ShapeDtypeStruct((B_pad, 1), jnp.float32),
        grid=grid,
        in_specs=[
            pl.BlockSpec((TB, K), lambda i: (i, 0)),
            pl.BlockSpec((TB, 1), lambda i: (i, 0)),
        ],
        out_specs=pl.BlockSpec((TB, 1), lambda i: (i, 0)),
        compiler_params=pltpu.CompilerParams(
            dimension_semantics=("parallel",),
            vmem_limit_bytes=int(max(vmem_est, 32 << 20)),
        ),
        cost_estimate=cost,
    )(inputs, targets_col)

    # Global mean over the *true* batch (padded rows excluded); tiny reduction
    # stays in the JAX wrapper.
    return jnp.sum(per_row[:B, 0]) / jnp.float32(B)


def _reference(inputs, targets, num_classes, epsilon=0.1):
    x = inputs.astype(jnp.float32)
    log_probs = jax.nn.log_softmax(x, axis=1)
    onehot = jax.nn.one_hot(targets, num_classes, dtype=jnp.float32)
    smooth = (1.0 - epsilon) * onehot + epsilon / num_classes
    return jnp.sum(jnp.mean(-smooth * log_probs, axis=0))


if __name__ == "__main__":
    key = jax.random.PRNGKey(0)
    k1, k2 = jax.random.split(key)

    batch, num_classes = 8, 16
    inputs = jax.random.normal(k1, (batch, num_classes), dtype=jnp.float32)
    targets = jax.random.randint(k2, (batch,), 0, num_classes, dtype=jnp.int32)

    loss = cross_entropy_label_smooth(
        inputs, targets, num_classes=num_classes, epsilon=0.1
    )
    jax.block_until_ready(loss)

    ref = _reference(inputs, targets, num_classes, epsilon=0.1)
    assert jnp.allclose(loss, ref, atol=1e-5, rtol=1e-5), (loss, ref)

    print("KERNEL_OK")
</pallas_src>

<mosaic_0001>
module attributes {stable_mosaic.version = 11 : i64} {
  func.func @_ce_label_smooth_kernel(%arg0: i32, %arg1: memref<8x16xf32, #tpu.memory_space<vmem>>, %arg2: memref<8x1xi32, #tpu.memory_space<vmem>>, %arg3: memref<8x1xf32, #tpu.memory_space<vmem>>) attributes {dimension_semantics = [#tpu.dimension_semantics<parallel>], iteration_bounds = array<i64: 1>, scalar_prefetch = 0 : i64, scratch_operands = 0 : i64, tpu.core_type = #tpu.core_type<tc>, window_params = [{transform_indices = @transform_0, window_bounds = array<i64: 8, 16>}, {transform_indices = @transform_1, window_bounds = array<i64: 8, 1>}, {transform_indices = @transform_2, window_bounds = array<i64: 8, 1>}]} {
    %c0 = arith.constant 0 : index
    %c0_0 = arith.constant 0 : index
    %0 = vector.load %arg1[%c0, %c0_0] : memref<8x16xf32, #tpu.memory_space<vmem>>, vector<8x16xf32>
    %c0_1 = arith.constant 0 : index
    %c0_2 = arith.constant 0 : index
    %1 = vector.load %arg2[%c0_1, %c0_2] : memref<8x1xi32, #tpu.memory_space<vmem>>, vector<8x1xi32>
    %cst = arith.constant dense<0xFF800000> : vector<8xf32>
    %2 = vector.multi_reduction <maximumf>, %0, %cst [1] : vector<8x16xf32> to vector<8xf32>
    %3 = vector.shape_cast %2 : vector<8xf32> to vector<8x1xf32>
    %4 = vector.broadcast %3 : vector<8x1xf32> to vector<8x16xf32>
    %5 = arith.subf %0, %4 : vector<8x16xf32>
    %6 = math.exp %5 : vector<8x16xf32>
    %cst_3 = arith.constant dense<0.000000e+00> : vector<8xf32>
    %7 = vector.multi_reduction <add>, %6, %cst_3 [1] : vector<8x16xf32> to vector<8xf32>
    %8 = vector.shape_cast %7 : vector<8xf32> to vector<8x1xf32>
    %9 = math.log %8 : vector<8x1xf32>
    %cst_4 = arith.constant dense<0.000000e+00> : vector<8xf32>
    %10 = vector.multi_reduction <add>, %5, %cst_4 [1] : vector<8x16xf32> to vector<8xf32>
    %11 = vector.shape_cast %10 : vector<8xf32> to vector<8x1xf32>
    %12 = tpu.iota {dimensions = array<i32: 1>} : vector<8x16xi32>
    %13 = vector.broadcast %1 : vector<8x1xi32> to vector<8x16xi32>
    %14 = arith.cmpi eq, %12, %13 : vector<8x16xi32>
    %cst_5 = arith.constant 0.000000e+00 : f32
    %15 = vector.broadcast %cst_5 : f32 to vector<8x16xf32>
    %16 = arith.select %14, %5, %15 : vector<8x16xi1>, vector<8x16xf32>
    %cst_6 = arith.constant dense<0.000000e+00> : vector<8xf32>
    %17 = vector.multi_reduction <add>, %16, %cst_6 [1] : vector<8x16xf32> to vector<8xf32>
    %18 = vector.shape_cast %17 : vector<8xf32> to vector<8x1xf32>
    %cst_7 = arith.constant 1.000000e+00 : f32
    %cst_8 = arith.constant 1.000000e-01 : f32
    %19 = arith.subf %cst_7, %cst_8 : f32
    %20 = vector.broadcast %19 : f32 to vector<8x1xf32>
    %21 = arith.mulf %20, %18 : vector<8x1xf32>
    %22 = arith.subf %9, %21 : vector<8x1xf32>
    %cst_9 = arith.constant 1.000000e-01 : f32
    %cst_10 = arith.constant 1.600000e+01 : f32
    %23 = arith.divf %cst_9, %cst_10 : f32
    %24 = vector.broadcast %23 : f32 to vector<8x1xf32>
    %25 = arith.mulf %24, %11 : vector<8x1xf32>
    %26 = arith.subf %22, %25 : vector<8x1xf32>
    %c0_11 = arith.constant 0 : index
    %c0_12 = arith.constant 0 : index
    %27 = vector.load %arg3[%c0_11, %c0_12] : memref<8x1xf32, #tpu.memory_space<vmem>>, vector<8x1xf32>
    tpu.vector_store %arg3[%c0_11, %c0_12], %26 {strides = array<i32>} : memref<8x1xf32, #tpu.memory_space<vmem>>, vector<8x1xf32>,
    return
  }
  func.func @transform_0(%arg0: i32) -> (i32, i32) {
    %c0_i32 = arith.constant 0 : i32
    %c0_i32_0 = arith.constant 0 : i32
    return %arg0, %c0_i32 : i32, i32
  }
  func.func @transform_1(%arg0: i32) -> (i32, i32) {
    %c0_i32 = arith.constant 0 : i32
    %c0_i32_0 = arith.constant 0 : i32
    return %arg0, %c0_i32 : i32, i32
  }
  func.func @transform_2(%arg0: i32) -> (i32, i32) {
    %c0_i32 = arith.constant 0 : i32
    %c0_i32_0 = arith.constant 0 : i32
    return %arg0, %c0_i32 : i32, i32
  }
}

</mosaic_0001>

<bundles_post_ra>
// kernel: tpu_custom_call.1
= control target key start
LH: loop header
LB: loop body
LE: loop exit
PB: predicated region body
PF: predicated region fallthrough
CT: control target
= control target key end

     0   :  { %vm13_vm0 = vcmask 130048   ;;  %v54_v1 = vmov 0   ;;  %v28_v10 = vlaneseq  ;;  %vm42_vm2 = vcmask 7168   ;;  %s83_s0 = inlined_call_operand.vmem [shape: f32[8,16], index: 0, kind: input, shape index: {}]   ;;  %s84_s1 = inlined_call_operand.vmem [shape: s32[8,1], index: 1, kind: input, shape index: {}]   ;;  %s85_s2 = inlined_call_operand.vmem [shape: f32[8,1], index: 2, kind: output, shape index: {}]  }
   0x1   :  { %v11_v0 = vld [vmem:[%s83_s0] sm:$0xff]  ;;  %49 = vset.pattern.permute.xlu0 %v54_v1 }
   0x2   :  { %v14_v2 = vsel %vm13_vm0, %v11_v0, -inf  ;;  %v12_v3 = vld [vmem:[%s84_s1] sm:$0xff]  ;;  %v29_v11 = vand.u32 127, %v28_v10 }
   0x3   :  { %15 = vmax.xlane.f32.xlu0 %v14_v2 }
  0x17   :  { %31 = vperm.xlu0 %49, %v12_v3  }
  0x76   :  { %v16_v4 = vpop.xlane.xlu0 %15 }
  0x77   :  { %v17_v5 = vsub.f32 %v11_v0, %v16_v4 }
  0x79   :  { %v18_v6 = vmul.f32 1.442695, %v17_v5  ;;  %v25_v7 = vsel %vm13_vm0, %v17_v5, 0.0 }
  0x7a   :  { %26 = vadd.xlane.f32.xlu2 %v25_v7 }
  0x7b   :  { %50 = vpow2.f32 %v18_v6 }
  0x81   :  { %v51_v8 = vpop.eup %50 }
  0x82   :  { %v20_v9 = vsel %vm13_vm0, %v51_v8, 0.0 }
  0x83   :  { %21 = vadd.xlane.f32.xlu1 %v20_v9 }
  0x89   :  { %v32_v12 = vpop.permute.xlu0 %31 }
  0x8a   :  { %vm33_vm1 = vcmp.eq.s32.totalorder %v29_v11, %v32_v12 }
  0x8b   :  { %v34_v13 = vsel %vm33_vm1, %v17_v5, 0.0 }
  0x8c   :  { %v35_v14 = vsel %vm13_vm0, %v34_v13, 0.0 }
  0x8d   :  { %36 = vadd.xlane.f32.xlu1 %v35_v14 }
  0xed   :  { %v27_v17 = vpop.xlane.xlu2 %26 }
  0xee   :  { %v40_v21 = vmul.f32 0.00625, %v27_v17 }
  0xf6   :  { %v22_v15 = vpop.xlane.xlu1 %21 }
  0xf7   :  { %52 = vlog2.f32 %v22_v15 }
  0xfd   :  { %v53_v16 = vpop.eup %52 }
  0xfe   :  { %v24_v19 = vmul.f32 0.6931472, %v53_v16 }
 0x100   :  { %v37_v18 = vpop.xlane.xlu1 %36 }
 0x101   :  { %v38_v20 = vmul.f32 0.9, %v37_v18 }
 0x103   :  { %v39_v22 = vsub.f32 %v24_v19, %v38_v20 }
 0x105   :  { %v41_v23 = vsub.f32 %v39_v22, %v40_v21 }
 0x107   :  { %43 = vst.msk [vmem:[%s85_s2] sm:$0xff] %vm42_vm2, %v41_v23 }

</bundles_post_ra>
